<compile_context>
chip_gen: v5e
topology: v5e:2x2
jax: 0.10.0
libtpu: 0.0.40
codegen_flags: <defaults>
</compile_context>

<pallas_src>
import functools

import jax
import jax.numpy as jnp
from jax.experimental import pallas as pl
from jax.experimental.pallas import tpu as pltpu


def dwconv_kernel(x_ref, w_ref, b_ref, o_ref, *, K, D):
    """Causal depthwise conv over a block of flattened (l*d) rows.

    x_ref: (G, L*D)  activations, one row per (batch, head) slice
    w_ref: (K, L*D)  per-column taps, already zeroed in the causal-pad region
    b_ref: (1, L*D)  per-column bias
    o_ref: (G, L*D)  output
    """
    x = x_ref[...].astype(jnp.float32)          # (G, LD)
    y = jnp.zeros_like(x) + b_ref[...]          # bias-initialized f32 accumulator

    # K is tiny (3/5/7) and static -> unroll the tap loop.
    for j in range(K):
        s = (K - 1 - j) * D                     # lane shift for this tap
        if s == 0:
            xs = x
        else:
            # xs[col] = x[col - s] (wrap-around values are killed by the
            # zeroed weights in w_ref for col < s).  XLU slot, ~free.
            xs = pltpu.roll(x, shift=s, axis=1)
        y = y + xs * w_ref[j:j + 1, :]

    # Single lane-dense store of the whole tile.
    o_ref[...] = y.astype(o_ref.dtype)


def depthwise_convolution(x, weight, bias):
    """x: (B, N, L, D); weight: (D, 1, K) PyTorch Conv1d layout; bias: (D,)."""
    B, N, L, D = x.shape
    K = weight.shape[-1]
    BN = B * N
    LD = L * D

    # ---- parameters, flattened to the lane-dense (l*d) layout --------------
    w_kd = jnp.transpose(weight[:, 0, :], (1, 0)).astype(jnp.float32)   # (K, D)
    w_tiled = jnp.tile(w_kd, (1, L))                                    # (K, LD)
    # Fold the causal-padding mask into the taps: tap j must not see columns
    # with l < (K-1-j), i.e. flat index < (K-1-j)*D.
    col = jnp.arange(LD, dtype=jnp.int32)[None, :]
    shifts = ((K - 1 - jnp.arange(K, dtype=jnp.int32)) * D)[:, None]
    w_masked = jnp.where(col >= shifts, w_tiled, 0.0)                   # (K, LD)
    b_tiled = jnp.tile(bias.reshape(1, D).astype(jnp.float32), (1, L))  # (1, LD)

    # ---- activations: (B, N, L, D) -> (B*N, L*D) contiguous reshape --------
    xf = x.reshape(BN, LD)

    # Rows per grid step: target ~2 MiB per tile to amortize pipeline overhead.
    bytes_per_row = LD * 4
    G = max(1, min(BN, (2 << 20) // max(1, bytes_per_row)))
    if G < BN:
        G = max(8, (G // 8) * 8)        # sublane-aligned block when tiling rows
    BN_pad = ((BN + G - 1) // G) * G
    if BN_pad != BN:
        xf = jnp.pad(xf, ((0, BN_pad - BN), (0, 0)))
    grid = (BN_pad // G,)

    # Explicit VMEM budget: double-buffered in/out tiles + params + headroom,
    # clamped under every generation's scoped limit (v5e/v6e/v7x).
    tile_bytes = G * LD * 4
    param_bytes = (K + 1) * LD * 4
    need = 6 * tile_bytes + 2 * param_bytes + (1 << 20)
    vmem_limit = int(min(max(need, 8 << 20), 32 << 20))

    kernel = functools.partial(dwconv_kernel, K=K, D=D)

    grid_spec = pltpu.PrefetchScalarGridSpec(
        num_scalar_prefetch=0,
        grid=grid,
        in_specs=[
            pl.BlockSpec((G, LD), lambda i: (i, 0)),   # activations
            pl.BlockSpec((K, LD), lambda i: (0, 0)),   # masked taps (shared)
            pl.BlockSpec((1, LD), lambda i: (0, 0)),   # bias (shared)
        ],
        out_specs=pl.BlockSpec((G, LD), lambda i: (i, 0)),
    )

    out = pl.pallas_call(
        kernel,
        out_shape=jax.ShapeDtypeStruct((BN_pad, LD), x.dtype),
        grid_spec=grid_spec,
        compiler_params=pltpu.CompilerParams(
            # Row blocks are independent -> megacore sharding on v7x.
            dimension_semantics=("parallel",),
            vmem_limit_bytes=vmem_limit,
        ),
    )(xf, w_masked, b_tiled)

    return out[:BN].reshape(B, N, L, D)


# ------------------------- pure-JAX reference -------------------------

def reference_forward(x, weight, bias):
    """Matches PyTorch: PadLeft(K-1) + Conv1d(D, D, K, groups=D) with bias."""
    B, N, L, D = x.shape
    K = weight.shape[-1]
    xp = jnp.pad(x, ((0, 0), (0, 0), (K - 1, 0), (0, 0)))
    y = jnp.zeros_like(x)
    for j in range(K):
        y = y + xp[:, :, j:j + L, :] * weight[:, 0, j][None, None, None, :]
    return y + bias[None, None, None, :]


if __name__ == "__main__":
    key = jax.random.PRNGKey(0)
    B, N, L, D, K = 2, 4, 16, 32, 7
    kx, kw, kb = jax.random.split(key, 3)

    x = jax.random.normal(kx, (B, N, L, D), jnp.float32)
    weight = jax.random.normal(kw, (D, 1, K), jnp.float32) * (1.0 / K)  # Conv1d layout
    bias = jax.random.normal(kb, (D,), jnp.float32) * 0.1

    out = depthwise_convolution(x, weight, bias)
    out = jax.block_until_ready(out)

    ref = reference_forward(x, weight, bias)
    assert out.shape == (B, N, L, D), "shape mismatch"
    assert bool(jnp.allclose(out, ref, atol=1e-5, rtol=1e-5)), "value mismatch"

    print("KERNEL_OK")
</pallas_src>

<mosaic_0001>
module attributes {stable_mosaic.version = 11 : i64} {
  func.func @dwconv_kernel(%arg0: i32, %arg1: memref<8x512xf32, #tpu.memory_space<vmem>>, %arg2: memref<7x512xf32, #tpu.memory_space<vmem>>, %arg3: memref<1x512xf32, #tpu.memory_space<vmem>>, %arg4: memref<8x512xf32, #tpu.memory_space<vmem>>) attributes {dimension_semantics = [#tpu.dimension_semantics<parallel>], iteration_bounds = array<i64: 1>, scalar_prefetch = 0 : i64, scratch_operands = 0 : i64, tpu.core_type = #tpu.core_type<tc>, window_params = [{transform_indices = @transform_0, window_bounds = array<i64: 8, 512>}, {pipeline_mode = #tpu.pipeline_mode<synchronous>, transform_indices = @transform_1, window_bounds = array<i64: 7, 512>}, {pipeline_mode = #tpu.pipeline_mode<synchronous>, transform_indices = @transform_2, window_bounds = array<i64: 1, 512>}, {transform_indices = @transform_3, window_bounds = array<i64: 8, 512>}]} {
    %c0 = arith.constant 0 : index
    %c0_0 = arith.constant 0 : index
    %0 = vector.load %arg1[%c0, %c0_0] : memref<8x512xf32, #tpu.memory_space<vmem>>, vector<8x512xf32>
    %cst = arith.constant 0.000000e+00 : f32
    %1 = vector.broadcast %cst : f32 to vector<8x512xf32>
    %c0_1 = arith.constant 0 : index
    %c0_2 = arith.constant 0 : index
    %2 = vector.load %arg3[%c0_1, %c0_2] : memref<1x512xf32, #tpu.memory_space<vmem>>, vector<1x512xf32>
    %3 = vector.broadcast %2 : vector<1x512xf32> to vector<8x512xf32>
    %4 = arith.addf %1, %3 : vector<8x512xf32>
    %c192_i32 = arith.constant 192 : i32
    %5 = tpu.dynamic_rotate %0 by %c192_i32 dim 1 : vector<8x512xf32>, i32 -> vector<8x512xf32>
    %c0_3 = arith.constant 0 : index
    %c0_4 = arith.constant 0 : index
    %6 = vector.load %arg2[%c0_3, %c0_4] : memref<7x512xf32, #tpu.memory_space<vmem>>, vector<1x512xf32>
    %7 = vector.broadcast %6 : vector<1x512xf32> to vector<8x512xf32>
    %8 = arith.mulf %5, %7 : vector<8x512xf32>
    %9 = arith.addf %4, %8 : vector<8x512xf32>
    %c160_i32 = arith.constant 160 : i32
    %10 = tpu.dynamic_rotate %0 by %c160_i32 dim 1 : vector<8x512xf32>, i32 -> vector<8x512xf32>
    %c1 = arith.constant 1 : index
    %c0_5 = arith.constant 0 : index
    %11 = vector.load %arg2[%c1, %c0_5] : memref<7x512xf32, #tpu.memory_space<vmem>>, vector<1x512xf32>
    %12 = vector.broadcast %11 : vector<1x512xf32> to vector<8x512xf32>
    %13 = arith.mulf %10, %12 : vector<8x512xf32>
    %14 = arith.addf %9, %13 : vector<8x512xf32>
    %c128_i32 = arith.constant 128 : i32
    %15 = tpu.dynamic_rotate %0 by %c128_i32 dim 1 : vector<8x512xf32>, i32 -> vector<8x512xf32>
    %c2 = arith.constant 2 : index
    %c0_6 = arith.constant 0 : index
    %16 = vector.load %arg2[%c2, %c0_6] : memref<7x512xf32, #tpu.memory_space<vmem>>, vector<1x512xf32>
    %17 = vector.broadcast %16 : vector<1x512xf32> to vector<8x512xf32>
    %18 = arith.mulf %15, %17 : vector<8x512xf32>
    %19 = arith.addf %14, %18 : vector<8x512xf32>
    %c96_i32 = arith.constant 96 : i32
    %20 = tpu.dynamic_rotate %0 by %c96_i32 dim 1 : vector<8x512xf32>, i32 -> vector<8x512xf32>
    %c3 = arith.constant 3 : index
    %c0_7 = arith.constant 0 : index
    %21 = vector.load %arg2[%c3, %c0_7] : memref<7x512xf32, #tpu.memory_space<vmem>>, vector<1x512xf32>
    %22 = vector.broadcast %21 : vector<1x512xf32> to vector<8x512xf32>
    %23 = arith.mulf %20, %22 : vector<8x512xf32>
    %24 = arith.addf %19, %23 : vector<8x512xf32>
    %c64_i32 = arith.constant 64 : i32
    %25 = tpu.dynamic_rotate %0 by %c64_i32 dim 1 : vector<8x512xf32>, i32 -> vector<8x512xf32>
    %c4 = arith.constant 4 : index
    %c0_8 = arith.constant 0 : index
    %26 = vector.load %arg2[%c4, %c0_8] : memref<7x512xf32, #tpu.memory_space<vmem>>, vector<1x512xf32>
    %27 = vector.broadcast %26 : vector<1x512xf32> to vector<8x512xf32>
    %28 = arith.mulf %25, %27 : vector<8x512xf32>
    %29 = arith.addf %24, %28 : vector<8x512xf32>
    %c32_i32 = arith.constant 32 : i32
    %30 = tpu.dynamic_rotate %0 by %c32_i32 dim 1 : vector<8x512xf32>, i32 -> vector<8x512xf32>
    %c5 = arith.constant 5 : index
    %c0_9 = arith.constant 0 : index
    %31 = vector.load %arg2[%c5, %c0_9] : memref<7x512xf32, #tpu.memory_space<vmem>>, vector<1x512xf32>
    %32 = vector.broadcast %31 : vector<1x512xf32> to vector<8x512xf32>
    %33 = arith.mulf %30, %32 : vector<8x512xf32>
    %34 = arith.addf %29, %33 : vector<8x512xf32>
    %c6 = arith.constant 6 : index
    %c0_10 = arith.constant 0 : index
    %35 = vector.load %arg2[%c6, %c0_10] : memref<7x512xf32, #tpu.memory_space<vmem>>, vector<1x512xf32>
    %36 = vector.broadcast %35 : vector<1x512xf32> to vector<8x512xf32>
    %37 = arith.mulf %0, %36 : vector<8x512xf32>
    %38 = arith.addf %34, %37 : vector<8x512xf32>
    %c0_11 = arith.constant 0 : index
    %c0_12 = arith.constant 0 : index
    %39 = vector.load %arg4[%c0_11, %c0_12] : memref<8x512xf32, #tpu.memory_space<vmem>>, vector<8x512xf32>
    tpu.vector_store %arg4[%c0_11, %c0_12], %38 {strides = array<i32>} : memref<8x512xf32, #tpu.memory_space<vmem>>, vector<8x512xf32>,
    return
  }
  func.func @transform_0(%arg0: i32) -> (i32, i32) {
    %c0_i32 = arith.constant 0 : i32
    %c0_i32_0 = arith.constant 0 : i32
    return %arg0, %c0_i32 : i32, i32
  }
  func.func @transform_1(%arg0: i32) -> (i32, i32) {
    %c0_i32 = arith.constant 0 : i32
    %c0_i32_0 = arith.constant 0 : i32
    %c0_i32_1 = arith.constant 0 : i32
    return %c0_i32, %c0_i32_0 : i32, i32
  }
  func.func @transform_2(%arg0: i32) -> (i32, i32) {
    %c0_i32 = arith.constant 0 : i32
    %c0_i32_0 = arith.constant 0 : i32
    %c0_i32_1 = arith.constant 0 : i32
    return %c0_i32, %c0_i32_0 : i32, i32
  }
  func.func @transform_3(%arg0: i32) -> (i32, i32) {
    %c0_i32 = arith.constant 0 : i32
    %c0_i32_0 = arith.constant 0 : i32
    return %arg0, %c0_i32 : i32, i32
  }
}

</mosaic_0001>

<bundles_post_ra>
// kernel: tpu_custom_call.1
= control target key start
LH: loop header
LB: loop body
LE: loop exit
PB: predicated region body
PF: predicated region fallthrough
CT: control target
= control target key end

     0   :  { %8 = vsyncpa [#allocation3], 0  ;;  %s538_s0 = inlined_call_operand.hbm [shape: f32[8,512], index: 0, kind: input, shape index: {}]   ;;  %s539_s1 = inlined_call_operand.hbm [shape: f32[7,512], index: 1, kind: input, shape index: {}]   ;;  %s540_s2 = inlined_call_operand.hbm [shape: f32[1,512], index: 2, kind: input, shape index: {}]   ;;  %s541_s3 = inlined_call_operand.hbm [shape: f32[8,512], index: 3, kind: output, shape index: {}]  }
   0x1   :  { %9 = vsyncpa [#allocation6], 0  ;;  %s27_s14 = sshll.u32 %s539_s1, 4  ;;  %s28_s14 = int_to_ptr.hbm [resolvable:$true] %s27_s14 }
   0x2   :  { %10 = vsyncpa [#allocation4], 0  ;;  %s378_s15 = smov [#allocation5]   ;;  %s16_s19 = sshll.u32 %s538_s0, 4  ;;  %s17_s19 = int_to_ptr.hbm [resolvable:$true] %s16_s19 }
   0x3   :  { %s29_s16 = sshll.u32 %s378_s15, 4  ;;  %s379_s20 = smov [#allocation2]   ;;  %s30_s16 = int_to_ptr.vmem [resolvable:$true] %s29_s16 }
   0x4   :  { %32 = dma.hbm_to_vmem [thread:$0]  %s28_s14, 512, %s30_s16, [#allocation6]  }
   0x5   :  { %s18_s21 = sshll.u32 %s379_s20, 4  ;;  %s38_s24 = sshll.u32 %s540_s2, 4  ;;  %s19_s21 = int_to_ptr.vmem [resolvable:$true] %s18_s21  ;;  %s39_s24 = int_to_ptr.hbm [resolvable:$true] %s38_s24 }
   0x6   :  { %21 = dma.hbm_to_vmem [thread:$0]  %s17_s19, 512, %s19_s21, [#allocation3]  }
   0x7   :  { %s380_s1 = smov [#allocation7]  }
   0x8   :  { %s40_s25 = sshll.u32 %s380_s1, 4  ;;  %s41_s25 = int_to_ptr.vmem [resolvable:$true] %s40_s25 }
   0x9   :  { %43 = dma.hbm_to_vmem [thread:$0]  %s39_s24, 64, %s41_s25, [#allocation6]  }
   0xa   :  { %372 = dma.done.wait [#allocation3], 512  }
   0xb   :  { %373 = vsyncadd [#allocation3], 4294966784 }
   0xc   :  { %374 = dma.done.wait [#allocation6], 576  }
   0xd   :  { %375 = vsyncadd [#allocation6], 4294966720  ;;  %v414_v0 = vld [vmem:[#allocation2 + $0x10] sm:$0xff]  ;;  %v416_v1 = vld [vmem:[#allocation2] sm:$0xff]  ;;  %s381_s0 = smov 64   ;;  %s382_s2 = smov 32   ;;  %v82_v7 = vlaneseq }
   0xe   :  { %78 = vrot.lane.b32.xlu1 %v414_v0, %s381_s0  ;;  %74 = vrot.lane.b32.xlu0 %v416_v1, %s381_s0  ;;  %v421_v2 = vld [vmem:[#allocation2 + $0x18] sm:$0xff]  ;;  %v423_v3 = vld [vmem:[#allocation2 + $0x8] sm:$0xff]  ;;  %s383_s26 = smov 96   ;;  %v60_v19 = vld [vmem:[#allocation7] sm:$0xf]  ;;  %s384_s27 = smov [#allocation8]  }
   0xf   :  { %107 = vrot.lane.b32.xlu2 %v416_v1, %s382_s2  ;;  %v438_v9 = vld [vmem:[#allocation5 + $0x6] ss:$8 sm:$0xf]  ;;  %v442_v12 = vand.u32 127, %v82_v7  ;;  %v62_v30 = vperm.slane %v60_v19, 0  ;;  %v63_v31 = vperm.slane %v60_v19, 1 }
  0x10   :  { %v233_v10 = vperm.slane %v438_v9, 2  ;;  %v231_v11 = vperm.slane %v438_v9, 0  ;;  %v121_v13 = vld [vmem:[#allocation5 + $0x1] ss:$8 sm:$0xf]  ;;  %v234_v17 = vperm.slane %v438_v9, 3 }
  0x11   :  { %v89_v14 = vld [vmem:[#allocation5] ss:$8 sm:$0xf]  ;;  %v446_v16 = vld [vmem:[#allocation5 + $0x5] ss:$8 sm:$0xf] }
  0x12   :  { %vm84_vm0 = vcmp.lt.s32.totalorder %v442_v12, 64  ;;  %v232_v18 = vperm.slane %v438_v9, 1  ;;  %v452_v20 = vmul.f32 %v233_v10, %v414_v0  ;;  %v455_v21 = vmul.f32 %v231_v11, %v416_v1  ;;  %v458_v22 = vld [vmem:[#allocation5 + $0x4] ss:$8 sm:$0xf]  ;;  %s256_s28 = sshll.u32 %s384_s27, 4  ;;  %s257_s28 = int_to_ptr.vmem [resolvable:$true] %s256_s28 }
  0x13   :  { %vm115_vm1 = vcmp.lt.s32.totalorder %v442_v12, 32  ;;  %v93_v24 = vperm.slane %v89_v14, 2  ;;  %v125_v26 = vperm.slane %v121_v13, 2  ;;  %v213_v27 = vperm.slane %v446_v16, 1  ;;  %s258_s4 = sshll.u32 %s541_s3, 4  ;;  %s259_s4 = int_to_ptr.hbm [resolvable:$true] %s258_s4 }
  0x14   :  { %v91_v28 = vperm.slane %v89_v14, 0  ;;  %v94_v33 = vperm.slane %v89_v14, 3  ;;  %v140_v34 = vld [vmem:[#allocation5 + $0x2] ss:$8 sm:$0xf]  ;;  %v92_v35 = vperm.slane %v89_v14, 1 }
  0x15   :  { %v193_v36 = vperm.slane %v458_v22, 0  ;;  %v64_v37 = vperm.slane %v60_v19, 2  ;;  %v483_v42 = vld [vmem:[#allocation5 + $0x3] ss:$8 sm:$0xf]  ;;  %v142_v43 = vperm.slane %v140_v34, 0 }
  0x16   :  { %80 = vrot.lane.b32.xlu1 %v421_v2, %s381_s0  ;;  %76 = vrot.lane.b32.xlu0 %v423_v3, %s381_s0  ;;  %v196_v44 = vperm.slane %v458_v22, 3  ;;  %v65_v46 = vperm.slane %v60_v19, 3  ;;  %v144_v47 = vperm.slane %v140_v34, 2  ;;  %v124_v49 = vperm.slane %v121_v13, 1 }
  0x17   :  { %109 = vrot.lane.b32.xlu2 %v423_v3, %s382_s2  ;;  %v123_v50 = vperm.slane %v121_v13, 0  ;;  %v126_v51 = vperm.slane %v121_v13, 3  ;;  %vm166_vm2 = vcmp.lt.s32.totalorder %v442_v12, 96  ;;  %v174_v54 = vperm.slane %v483_v42, 0 }
  0x18   :  { %v150_v58 = vmul.f32 %v142_v43, %v421_v2  ;;  %v145_v60 = vperm.slane %v140_v34, 3  ;;  %v143_v61 = vperm.slane %v140_v34, 1  ;;  %v212_v19 = vperm.slane %v446_v16, 0 }
  0x19   :  { %v240_v12 = vmul.f32 %v232_v18, %v423_v3 }
  0x1e   :  { %113 = vrot.lane.b32.xlu1 %v421_v2, %s382_s2  ;;  %111 = vrot.lane.b32.xlu0 %v414_v0, %s382_s2 }
  0x1f   :  { %158 = vrot.lane.b32.xlu2 %v416_v1, %s383_s26 }
  0x26   :  { %162 = vrot.lane.b32.xlu1 %v414_v0, %s383_s26  ;;  %160 = vrot.lane.b32.xlu0 %v423_v3, %s383_s26 }
  0x27   :  { %164 = vrot.lane.b32.xlu2 %v421_v2, %s383_s26 }
  0x69   :  { %v434_v4 = vpop.permute.xlu2 %107 }
  0x71   :  { %v436_v5 = vpop.permute.xlu2 %109 }
  0x72   :  { %v478_v39 = vsel %vm115_vm1, %v434_v4, %v436_v5 }
  0x73   :  { %v133_v52 = vmul.f32 %v125_v26, %v478_v39 }
  0x79   :  { %v444_v15 = vpop.permute.xlu2 %158 }
  0x80   :  { %v79_v6 = vpop.permute.xlu1 %78  ;;  %v75_v8 = vpop.permute.xlu0 %74 }
  0x81   :  { %v165_v55 = vpop.permute.xlu2 %164 }
  0x88   :  { %v81_v23 = vpop.permute.xlu1 %80  ;;  %v77_v25 = vpop.permute.xlu0 %76 }
  0x89   :  { %v463_v29 = vsel %vm84_vm0, %v75_v8, %v77_v25  ;;  %v467_v32 = vsel %vm84_vm0, %v79_v6, %v81_v23  ;;  %v472_v38 = vsel %vm84_vm0, %v77_v25, %v79_v6  ;;  %v88_v40 = vsel %vm84_vm0, %v81_v23, %v75_v8 }
  0x8a   :  { %v101_v41 = vmul.f32 %v93_v24, %v463_v29  ;;  %v99_v45 = vmul.f32 %v91_v28, %v467_v32  ;;  %v102_v48 = vmul.f32 %v94_v33, %v472_v38  ;;  %v100_v53 = vmul.f32 %v92_v35, %v88_v40 }
  0x8b   :  { %v170_v23 = vsel %vm166_vm2, %v165_v55, %v444_v15  ;;  %v153_v28 = vmul.f32 %v145_v60, %v414_v0  ;;  %v177_v33 = vperm.slane %v483_v42, 3  ;;  %v201_v43 = vmul.f32 %v193_v36, %v88_v40 }
  0x8c   :  { %v105_v56 = vadd.f32 %v101_v41, %v64_v37  ;;  %v103_v62 = vadd.f32 %v99_v45, %v62_v30  ;;  %v106_v8 = vadd.f32 %v102_v48, %v65_v46  ;;  %v104_v14 = vadd.f32 %v100_v53, %v63_v31 }
  0x8d   :  { %v151_v31 = vmul.f32 %v143_v61, %v416_v1  ;;  %v182_v34 = vmul.f32 %v174_v54, %v170_v23  ;;  %v175_v37 = vperm.slane %v483_v42, 1  ;;  %v176_v41 = vperm.slane %v483_v42, 2 }
  0x8e   :  { %v137_v24 = vadd.f32 %v133_v52, %v105_v56  ;;  %v195_v45 = vperm.slane %v458_v22, 2  ;;  %v214_v46 = vperm.slane %v446_v16, 2  ;;  %v215_v0 = vperm.slane %v446_v16, 3 }
  0x90   :  { %v114_v57 = vpop.permute.xlu1 %113  ;;  %v112_v59 = vpop.permute.xlu0 %111 }
  0x91   :  { %v119_v63 = vsel %vm115_vm1, %v114_v57, %v434_v4  ;;  %v116_v6 = vsel %vm115_vm1, %v112_v59, %v114_v57  ;;  %v117_v7 = vsel %vm115_vm1, %v436_v5, %v112_v59  ;;  %v152_v4 = vmul.f32 %v144_v47, %v423_v3 }
  0x92   :  { %v132_v10 = vmul.f32 %v124_v49, %v119_v63  ;;  %v131_v11 = vmul.f32 %v123_v50, %v116_v6  ;;  %v134_v13 = vmul.f32 %v126_v51, %v117_v7  ;;  %v194_v5 = vperm.slane %v458_v22, 1 }
  0x93   :  { %v220_v47 = vmul.f32 %v212_v19, %v119_v63  ;;  %v156_v51 = vadd.f32 %v152_v4, %v137_v24  ;;  %v242_v57 = vmul.f32 %v234_v17, %v421_v2  ;;  %v203_v59 = vmul.f32 %v195_v45, %v472_v38 }
  0x94   :  { %v135_v25 = vadd.f32 %v131_v11, %v103_v62  ;;  %v138_v26 = vadd.f32 %v134_v13, %v106_v8  ;;  %v136_v30 = vadd.f32 %v132_v10, %v104_v14  ;;  %v222_v8 = vmul.f32 %v214_v46, %v117_v7 }
  0x95   :  { %v223_v2 = vmul.f32 %v215_v0, %v116_v6 }
  0x96   :  { %v154_v35 = vadd.f32 %v150_v58, %v135_v25  ;;  %v157_v50 = vadd.f32 %v153_v28, %v138_v26  ;;  %v155_v53 = vadd.f32 %v151_v31, %v136_v30  ;;  %v204_v58 = vmul.f32 %v196_v44, %v467_v32 }
  0x98   :  { %v186_v48 = vadd.f32 %v182_v34, %v154_v35  ;;  %v163_v49 = vpop.permute.xlu1 %162  ;;  %v161_v52 = vpop.permute.xlu0 %160 }
  0x99   :  { %v167_v1 = vsel %vm166_vm2, %v163_v49, %v165_v55  ;;  %v168_v42 = vsel %vm166_vm2, %v161_v52, %v163_v49  ;;  %v169_v22 = vsel %vm166_vm2, %v444_v15, %v161_v52  ;;  %v202_v55 = vmul.f32 %v194_v5, %v463_v29 }
  0x9a   :  { %v205_v36 = vadd.f32 %v201_v43, %v186_v48  ;;  %v185_v40 = vmul.f32 %v177_v33, %v167_v1  ;;  %v183_v54 = vmul.f32 %v175_v37, %v169_v22  ;;  %v184_v56 = vmul.f32 %v176_v41, %v168_v42 }
  0x9b   :  { %v221_v15 = vmul.f32 %v213_v27, %v478_v39 }
  0x9c   :  { %v224_v60 = vadd.f32 %v220_v47, %v205_v36  ;;  %v189_v61 = vadd.f32 %v185_v40, %v157_v50  ;;  %v187_v62 = vadd.f32 %v183_v54, %v155_v53  ;;  %v188_v63 = vadd.f32 %v184_v56, %v156_v51 }
  0x9e   :  { %v208_v17 = vadd.f32 %v204_v58, %v189_v61  ;;  %v206_v32 = vadd.f32 %v202_v55, %v187_v62  ;;  %v207_v44 = vadd.f32 %v203_v59, %v188_v63  ;;  %v243_v29 = vadd.f32 %v455_v21, %v224_v60 }
  0xa0   :  { %v227_v38 = vadd.f32 %v223_v2, %v208_v17  ;;  %v225_v10 = vadd.f32 %v221_v15, %v206_v32  ;;  %v226_v11 = vadd.f32 %v222_v8, %v207_v44  ;;  %247 = vst [vmem:[#allocation8] sm:$0xff] %v243_v29 }
  0xa2   :  { %v246_v3 = vadd.f32 %v242_v57, %v227_v38  ;;  %v244_v9 = vadd.f32 %v240_v12, %v225_v10  ;;  %v245_v16 = vadd.f32 %v452_v20, %v226_v11 }
  0xa4   :  { %250 = vst [vmem:[#allocation8 + $0x18] sm:$0xff] %v246_v3 }
  0xa5   :  { %248 = vst [vmem:[#allocation8 + $0x8] sm:$0xff] %v244_v9 }
  0xa6   :  { %249 = vst [vmem:[#allocation8 + $0x10] sm:$0xff] %v245_v16 }
  0xa7   :  { %261 = dma.vmem_to_hbm [thread:$0]  %s257_s28, 512, %s259_s4, [#allocation4]  }
  0xa8   :  { %376 = dma.done.wait [#allocation4], 512  }
  0xa9   :  { %377 = vsyncadd [#allocation4], 4294966784 }
  0xaa   :  { %266 = vsyncpa [#allocation3], 1 }
  0xab   :  { %267 = vsyncpa [#allocation6], 1 }
  0xac   :  { %268 = vsyncpa [#allocation4], 1 }

</bundles_post_ra>
